<compile_context>
chip_gen: v7x
topology: tpu7x:2x2x1
jax: 0.10.0
libtpu: 0.0.40
codegen_flags: <defaults>
</compile_context>

<pallas_src>
import jax
import jax.numpy as jnp
from jax.experimental import pallas as pl
from jax.experimental.pallas import tpu as pltpu


def _round_up(x, m):
    return ((x + m - 1) // m) * m


def _logreg_kernel(x_ref, w_ref, b_ref, o_ref):
    # Cast the streamed f32 activation tile to bf16 at the MXU boundary
    # (VPU work, hidden under the DMA); accumulate in f32 on the MXU.
    x = x_ref[...].astype(jnp.bfloat16)
    logits = jnp.dot(x, w_ref[...], preferred_element_type=jnp.float32)
    logits = logits + b_ref[...]  # padded lanes: bias = -1e30 -> exp underflows to 0

    # Numerically stable log_softmax along dim=1 (last axis), all in f32.
    m = jnp.max(logits, axis=-1, keepdims=True)
    shifted = logits - m
    lse = jnp.log(jnp.sum(jnp.exp(shifted), axis=-1, keepdims=True))
    o_ref[...] = (shifted - lse).astype(o_ref.dtype)


def prepare_logreg_params(weight, bias):
    """One-time packing of nn.Linear params (torch layout).

    weight: (label_size, feature_size) f32, bias: (label_size,) f32.
    Returns (w_p, b_p): bf16 (F_pad, L_pad) weight and f32 (1, L_pad) bias with
    -1e30 in the padded label lanes.  Reuse across forward calls.
    """
    L, F = weight.shape
    F_pad = F if F % 128 == 0 else _round_up(F, 128)
    L_pad = _round_up(max(L, 128), 128)

    w_p = (
        jnp.zeros((F_pad, L_pad), jnp.bfloat16)
        .at[:F, :L].set(weight.T.astype(jnp.bfloat16))
    )
    b_p = (
        jnp.full((1, L_pad), -1e30, dtype=jnp.float32)
        .at[0, :L].set(bias.astype(jnp.float32))
    )
    return w_p, b_p


def _choose_tb(B, block_batch):
    """Batch tile: full block for tiny B, else >=2 grid steps (v7x megacore)."""
    if B <= 32:
        return B  # single full-extent batch block (always layout-legal)
    half = -(-B // 2)
    return min(block_batch, _round_up(half, 16))  # always <= B for B > 32


def _resident_block_spec(block_shape):
    """Constant-index resident operand; single-buffer it when supported."""
    index_map = lambda i: (0,) * len(block_shape)
    try:
        return pl.BlockSpec(block_shape, index_map, pipeline_mode=pl.Buffered(1))
    except (AttributeError, TypeError):
        return pl.BlockSpec(block_shape, index_map)


def logistic_regression_forward(x, w_p, b_p, label_size, *, block_batch=512):
    """x: (B, F) f32; w_p/b_p from prepare_logreg_params.

    Returns (B, label_size) f32 log-probabilities along axis 1.
    """
    B, F = x.shape
    F_pad, L_pad = w_p.shape

    # Only zero-pad the contraction tail when F is not 128-aligned.
    if F != F_pad:
        x = jnp.pad(x, ((0, 0), (0, F_pad - F)))
    x = x.astype(jnp.float32)

    TB = _choose_tb(B, block_batch)

    # VMEM budget: double-buffered x/out tiles + single-buffered resident
    # weight/bias + headroom; capped below the physical per-core VMEM.
    def _needed(tb):
        x_tile = tb * F_pad * 4          # f32 stream
        o_tile = tb * L_pad * 4          # f32 out
        w_b = F_pad * L_pad * 2          # bf16 resident weight
        b_b = 8 * L_pad * 4              # f32 bias (sublane-padded)
        return 2 * (x_tile + o_tile) + w_b + b_b + (4 << 20)

    try:
        phys = int(pltpu.get_tpu_info().vmem_capacity_bytes)
    except Exception:
        phys = 64 << 20  # conservative: v7x per-TensorCore VMEM
    cap = int(phys * 0.85)

    # Shrink the batch tile if the pipeline would not fit (v7x 64 MiB / TC).
    while _needed(TB) > cap and TB > 64:
        TB = max(64, TB // 2)

    needed = _needed(TB)
    vmem_limit = int(min(max(needed, 16 << 20), cap))
    grid = (pl.cdiv(B, TB),)  # unpadded batch; partial last block is masked

    out = pl.pallas_call(
        _logreg_kernel,
        out_shape=jax.ShapeDtypeStruct((B, L_pad), jnp.float32),
        grid_spec=pl.GridSpec(
            grid=grid,
            in_specs=[
                pl.BlockSpec((TB, F_pad), lambda i: (i, 0)),   # streamed x tiles
                _resident_block_spec((F_pad, L_pad)),          # resident weight
                _resident_block_spec((1, L_pad)),              # resident bias
            ],
            out_specs=pl.BlockSpec((TB, L_pad), lambda i: (i, 0)),
        ),
        compiler_params=pltpu.CompilerParams(
            dimension_semantics=("parallel",),
            vmem_limit_bytes=vmem_limit,
        ),
    )(x, w_p, b_p)

    return out[:, :label_size]


if __name__ == "__main__":
    # Deterministic synthetic setup, small shapes matching the module.
    batch = 8
    feature_size = 32
    label_size = 16

    key = jax.random.PRNGKey(0)
    kx, kw, kb = jax.random.split(key, 3)

    x = jax.random.normal(kx, (batch, feature_size), dtype=jnp.float32)
    # nn.Linear(feature_size, label_size): weight (L, F), bias (L,).
    bound = 1.0 / (feature_size ** 0.5)
    weight = jax.random.uniform(
        kw, (label_size, feature_size), minval=-bound, maxval=bound,
        dtype=jnp.float32,
    )
    bias = jax.random.uniform(
        kb, (label_size,), minval=-bound, maxval=bound, dtype=jnp.float32
    )

    # Params packed once (hoisted out of the per-call path).
    w_p, b_p = prepare_logreg_params(weight, bias)

    out = logistic_regression_forward(x, w_p, b_p, label_size)
    out = jax.block_until_ready(out)

    # Reference in plain JAX with the same bf16 rounding as the kernel's matmul.
    xb = x.astype(jnp.bfloat16).astype(jnp.float32)
    wb = weight.T.astype(jnp.bfloat16).astype(jnp.float32)
    logits_ref = jnp.dot(xb, wb, precision=jax.lax.Precision.HIGHEST) + bias
    ref = jax.nn.log_softmax(logits_ref, axis=1)

    assert out.shape == (batch, label_size)
    max_err = float(jnp.max(jnp.abs(out - ref)))
    assert jnp.allclose(out, ref, atol=5e-4, rtol=5e-4), max_err

    print("KERNEL_OK")
</pallas_src>

<mosaic_0001>
module attributes {stable_mosaic.version = 11 : i64} {
  func.func @_logreg_kernel(%arg0: i32, %arg1: memref<8x128xf32, #tpu.memory_space<vmem>>, %arg2: memref<128x128xbf16, #tpu.memory_space<vmem>>, %arg3: memref<1x128xf32, #tpu.memory_space<vmem>>, %arg4: memref<8x128xf32, #tpu.memory_space<vmem>>) attributes {dimension_semantics = [#tpu.dimension_semantics<parallel>], iteration_bounds = array<i64: 1>, scalar_prefetch = 0 : i64, scratch_operands = 0 : i64, tpu.core_type = #tpu.core_type<tc>, window_params = [{transform_indices = @transform_0, window_bounds = array<i64: 8, 128>}, {pipeline_mode = #tpu.pipeline_mode<synchronous>, transform_indices = @transform_1, window_bounds = array<i64: 128, 128>}, {pipeline_mode = #tpu.pipeline_mode<synchronous>, transform_indices = @transform_2, window_bounds = array<i64: 1, 128>}, {transform_indices = @transform_3, window_bounds = array<i64: 8, 128>}]} {
    %c0 = arith.constant 0 : index
    %c0_0 = arith.constant 0 : index
    %0 = vector.load %arg1[%c0, %c0_0] : memref<8x128xf32, #tpu.memory_space<vmem>>, vector<8x128xf32>
    %1 = arith.truncf %0 : vector<8x128xf32> to vector<8x128xbf16>
    %c0_1 = arith.constant 0 : index
    %c0_2 = arith.constant 0 : index
    %2 = vector.load %arg2[%c0_1, %c0_2] : memref<128x128xbf16, #tpu.memory_space<vmem>>, vector<128x128xbf16>
    %cst = arith.constant dense<0.000000e+00> : vector<8x128xf32>
    %3 = tpu.matmul %1, %2, %cst {dimension_numbers = #tpu.dot_dimension_numbers<[1], [0], [0], [1], [0, 0, 1, 1], [], []>} : vector<8x128xbf16>, vector<128x128xbf16>, vector<8x128xf32> -> vector<8x128xf32>
    %c0_3 = arith.constant 0 : index
    %c0_4 = arith.constant 0 : index
    %4 = vector.load %arg3[%c0_3, %c0_4] : memref<1x128xf32, #tpu.memory_space<vmem>>, vector<1x128xf32>
    %5 = vector.broadcast %4 : vector<1x128xf32> to vector<8x128xf32>
    %6 = arith.addf %3, %5 : vector<8x128xf32>
    %cst_5 = arith.constant dense<0xFF800000> : vector<8xf32>
    %7 = vector.multi_reduction <maximumf>, %6, %cst_5 [1] : vector<8x128xf32> to vector<8xf32>
    %8 = vector.shape_cast %7 : vector<8xf32> to vector<8x1xf32>
    %9 = vector.broadcast %8 : vector<8x1xf32> to vector<8x128xf32>
    %10 = arith.subf %6, %9 : vector<8x128xf32>
    %11 = math.exp %10 : vector<8x128xf32>
    %cst_6 = arith.constant dense<0.000000e+00> : vector<8xf32>
    %12 = vector.multi_reduction <add>, %11, %cst_6 [1] : vector<8x128xf32> to vector<8xf32>
    %13 = vector.shape_cast %12 : vector<8xf32> to vector<8x1xf32>
    %14 = math.log %13 : vector<8x1xf32>
    %15 = vector.broadcast %14 : vector<8x1xf32> to vector<8x128xf32>
    %16 = arith.subf %10, %15 : vector<8x128xf32>
    %c0_7 = arith.constant 0 : index
    %c0_8 = arith.constant 0 : index
    %17 = vector.load %arg4[%c0_7, %c0_8] : memref<8x128xf32, #tpu.memory_space<vmem>>, vector<8x128xf32>
    tpu.vector_store %arg4[%c0_7, %c0_8], %16 {strides = array<i32>} : memref<8x128xf32, #tpu.memory_space<vmem>>, vector<8x128xf32>,
    return
  }
  func.func @transform_0(%arg0: i32) -> (i32, i32) {
    %c0_i32 = arith.constant 0 : i32
    %c0_i32_0 = arith.constant 0 : i32
    return %arg0, %c0_i32 : i32, i32
  }
  func.func @transform_1(%arg0: i32) -> (i32, i32) {
    %c0_i32 = arith.constant 0 : i32
    %c0_i32_0 = arith.constant 0 : i32
    %c0_i32_1 = arith.constant 0 : i32
    return %c0_i32, %c0_i32_0 : i32, i32
  }
  func.func @transform_2(%arg0: i32) -> (i32, i32) {
    %c0_i32 = arith.constant 0 : i32
    %c0_i32_0 = arith.constant 0 : i32
    %c0_i32_1 = arith.constant 0 : i32
    return %c0_i32, %c0_i32_0 : i32, i32
  }
  func.func @transform_3(%arg0: i32) -> (i32, i32) {
    %c0_i32 = arith.constant 0 : i32
    %c0_i32_0 = arith.constant 0 : i32
    return %arg0, %c0_i32 : i32, i32
  }
}

</mosaic_0001>

<bundles_post_ra>
// kernel: tpu_custom_call.1
= control target key start
LH: loop header
LB: loop body
LE: loop exit
PB: predicated region body
PF: predicated region fallthrough
CT: control target
= control target key end

     0   :  { %8 = vsyncpa [#allocation3], 0  ;;  %s384_s0 = inlined_call_operand.hbm [shape: f32[8,128], index: 0, kind: input, shape index: {}]   ;;  %s385_s1 = inlined_call_operand.hbm [shape: bf16[128,128], index: 1, kind: input, shape index: {}]   ;;  %s386_s2 = inlined_call_operand.vmem [shape: f32[1,128], index: 2, kind: input, shape index: {}]   ;;  %s387_s3 = inlined_call_operand.hbm [shape: f32[8,128], index: 3, kind: output, shape index: {}]  }
   0x1   :  { %9 = vsyncpa [#allocation6], 0 }
   0x2   :  { %10 = vsyncpa [#allocation4], 0  ;;  %s311_s12 = smov [#allocation2]   ;;  %s312_s14 = smov [#allocation5]  }
   0x3   :  { %s17_s13 = sshll.u32 %s311_s12, 4  ;;  %s26_s15 = sshll.u32 %s312_s14, 4  ;;  %s18_s13 = int_to_ptr.vmem [resolvable:$true] %s17_s13  ;;  %s338_s15 = int_to_ptr.vmem [resolvable:$true] %s26_s15 }
   0x4   :  { %s239_s18 = scalar_lea.hbm %s384_s0, 128 }
   0x5   :  { %p240_p0 = scmp.ne.s32.totalorder %s384_s0, %s239_s18  ;;  %p243_p1 = scmp.lt.u32.totalorder %s239_s18, %s384_s0 }
   0x7   :  { %p245_p2 = pnand %p243_p1, %p240_p0 }
   0x9   :  { %248 = shalt.err (!%p245_p2)
}
   0xa   :  { %s249_s23 = scalar_lea.vmem %s18_s13, 128  ;;  %p254_p4 = scmp.lt.s32.totalorder %s18_s13, %s18_s13 }
   0xb   :  { %p250_p3 = scmp.ne.s32.totalorder %s18_s13, %s249_s23  ;;  %p255_p5 = scmp.lt.s32.totalorder %s249_s23, %s249_s23 }
   0xd   :  { %p256_p6 = por %p255_p5, %p254_p4 }
   0xf   :  { %p257_p7 = pnand %p256_p6, %p250_p3 }
  0x11   :  { %260 = shalt.err (!%p257_p7)
}
  0x12   :  { %20 = dma.hbm_to_vmem [thread:$0]  %s384_s0, 128, %s18_s13, [#allocation3]  }
  0x13   :  { %s261_s28 = scalar_lea.hbm %s385_s1, 1024 }
  0x14   :  { %p262_p8 = scmp.ne.s32.totalorder %s385_s1, %s261_s28  ;;  %p265_p9 = scmp.lt.u32.totalorder %s261_s28, %s385_s1 }
  0x16   :  { %p267_p10 = pnand %p265_p9, %p262_p8 }
  0x18   :  { %270 = shalt.err (!%p267_p10)
}
  0x19   :  { %s271_s6 = scalar_lea.vmem %s338_s15, 1024  ;;  %p276_p12 = scmp.lt.s32.totalorder %s338_s15, %s338_s15 }
  0x1a   :  { %p272_p11 = scmp.ne.s32.totalorder %s338_s15, %s271_s6  ;;  %p277_p13 = scmp.lt.s32.totalorder %s271_s6, %s271_s6 }
  0x1c   :  { %p278_p0 = por %p277_p13, %p276_p12 }
  0x1e   :  { %p279_p1 = pnand %p278_p0, %p272_p11 }
  0x20   :  { %282 = shalt.err (!%p279_p1)
}
  0x21   :  { %s313_s0 = smov 64   ;;  %s314_s7 = smov 4  }
  0x22   :  { %32 = dma.hbm_to_vmem [thread:$0]  %s385_s1, 1024, %s338_s15, [#allocation6], %s313_s0, %s313_s0, %s314_s7  }
  0x23   :  { %305 = dma.done.wait [#allocation3], 128  }
  0x24   :  { %306 = vsyncadd [#allocation3], 4294967168 }
  0x25   :  { %307 = dma.done.wait [#allocation6], 1024  }
  0x26   :  { %308 = vsyncadd [#allocation6], 4294966272  ;;  %v315_v0 = vmov 0.0   ;;  %vm316_vm0 = vmmov 0   ;;  %v227_v1 = vld [vmem:[#allocation5] sm:$0xff]   ;;  %v228_v2 = vld [vmem:[#allocation5 + $0x8] sm:$0xff]  }
  0x27   :  { %200 = vmatprep.subr.bf16.mxu0 %v315_v0  ;;  %216 = vmatprep.mubr.msk.bf16.mxu0 %vm316_vm0, %v315_v0  ;;  %v229_v3 = vld [vmem:[#allocation5 + $0x10] sm:$0xff]   ;;  %v230_v4 = vld [vmem:[#allocation5 + $0x18] sm:$0xff]   ;;  %v231_v5 = vld [vmem:[#allocation5 + $0x20] sm:$0xff]   ;;  %s317_s11 = smov [#allocation7]  }
  0x28   :  { %201 = vmatpush3.bf16.msra.mxu0 %v227_v1  ;;  %v232_v6 = vld [vmem:[#allocation5 + $0x28] sm:$0xff]   ;;  %v233_v7 = vld [vmem:[#allocation5 + $0x30] sm:$0xff]   ;;  %v234_v8 = vld [vmem:[#allocation5 + $0x38] sm:$0xff]   ;;  %s172_s12 = sshll.u32 %s317_s11, 4  ;;  %s173_s12 = int_to_ptr.vmem [resolvable:$true] %s172_s12 }
  0x29   :  { %202 = vmatprep.subr.bf16.mxu0 %v315_v0  ;;  %v42_v9 = vld [vmem:[#allocation2] sm:$0xff]  ;;  %p288_p3 = scmp.lt.s32.totalorder %s173_s12, %s173_s12 }
  0x2a   :  { %v43_v10 = vpack.c.bf16 %v42_v9, %v42_v9  ;;  %v182_v11 = vld [vmem:[%s386_s2] ss:$0 sm:$0xff]  ;;  %s283_s2 = scalar_lea.vmem %s173_s12, 128 }
  0x2b   :  { %p284_p2 = scmp.ne.s32.totalorder %s173_s12, %s283_s2  ;;  %p289_p4 = scmp.lt.s32.totalorder %s283_s2, %s283_s2 }
  0x2c   :  { %203 = vmatpush3.bf16.msra.mxu0 %v228_v2 }
  0x2d   :  { %204 = vmatprep.subr.bf16.mxu0 %v315_v0  ;;  %p290_p5 = por %p289_p4, %p288_p3 }
  0x2f   :  { %p291_p6 = pnand %p290_p5, %p284_p2 }
  0x30   :  { %205 = vmatpush3.bf16.msra.mxu0 %v229_v3 }
  0x31   :  { %206 = vmatprep.subr.bf16.mxu0 %v315_v0 }
  0x34   :  { %207 = vmatpush3.bf16.msra.mxu0 %v230_v4 }
  0x35   :  { %208 = vmatprep.subr.bf16.mxu0 %v315_v0 }
  0x38   :  { %209 = vmatpush3.bf16.msra.mxu0 %v231_v5 }
  0x39   :  { %210 = vmatprep.subr.bf16.mxu0 %v315_v0 }
  0x3c   :  { %211 = vmatpush3.bf16.msra.mxu0 %v232_v6 }
  0x3d   :  { %212 = vmatprep.subr.bf16.mxu0 %v315_v0 }
  0x40   :  { %213 = vmatpush3.bf16.msra.mxu0 %v233_v7 }
  0x41   :  { %214 = vmatprep.subr.bf16.mxu0 %v315_v0 }
  0x44   :  { %215 = vmatpush3.bf16.msra.mxu0 %v234_v8 }
  0x47   :  { %217 = vmatmul.mubr.bf16.vlgmr.msra.gmra.mrb[0].mxu0 %v43_v10 }
 0x11a   :  { %v149_v12 = vpop.f32.mrb[0].mxu0 }
 0x11b   :  { %v150_v13 = vadd.f32 %v182_v11, %v149_v12  ;;  %v218_v14 = vpop.f32.mrb[1].mxu0 }
 0x11c   :  { %v152_v15 = vpop.f32.mrb[2].mxu0 }
 0x11d   :  { %155 = vmax.xlane.f32.xlu0 %v150_v13  ;;  %v219_v16 = vpop.f32.mrb[3].mxu0 }
 0x1aa   :  { %v156_v17 = vpop.xlane.xlu0 %155 }
 0x1ab   :  { %v157_v18 = vsub.f32 %v150_v13, %v156_v17 }
 0x1ad   :  { %v158_v19 = vmul.f32 1.442695, %v157_v18 }
 0x1af   :  { %235 = vpow2.f32 %v158_v19 }
 0x1b9   :  { %v236_v20 = vpop.eup %235 }
 0x1ba   :  { %160 = vadd.xlane.f32.xlu0 %v236_v20 }
 0x247   :  { %v161_v21 = vpop.xlane.xlu0 %160 }
 0x248   :  { %237 = vlog2.f32 %v161_v21 }
 0x252   :  { %v238_v22 = vpop.eup %237 }
 0x253   :  { %v163_v23 = vmul.f32 0.6931472, %v238_v22 }
 0x255   :  { %v164_v24 = vsub.f32 %v157_v18, %v163_v23 }
 0x257   :  { %165 = vst [vmem:[#allocation7] sm:$0xff] %v164_v24 }
 0x258   :  { %294 = shalt.err (!%p291_p6)
}
 0x259   :  { %s295_s15 = scalar_lea.hbm %s387_s3, 128 }
 0x25a   :  { %p296_p7 = scmp.ne.s32.totalorder %s387_s3, %s295_s15  ;;  %p299_p8 = scmp.lt.u32.totalorder %s295_s15, %s387_s3 }
 0x25c   :  { %p301_p9 = pnand %p299_p8, %p296_p7 }
 0x25e   :  { %304 = shalt.err (!%p301_p9)
}
 0x25f   :  { %175 = dma.vmem_to_hbm [thread:$0]  %s173_s12, 128, %s387_s3, [#allocation4]  }
 0x260   :  { %309 = dma.done.wait [#allocation4], 128  }
 0x261   :  { %310 = vsyncadd [#allocation4], 4294967168 }
 0x262   :  { %179 = vsyncpa [#allocation3], 1 }
 0x263   :  { %180 = vsyncpa [#allocation6], 1 }
 0x264   :  { %181 = vsyncpa [#allocation4], 1 }

</bundles_post_ra>
